<compile_context>
chip_gen: v7x
topology: tpu7x:2x2x1
jax: 0.10.0
libtpu: 0.0.40
codegen_flags: <defaults>
</compile_context>

<pallas_src>
import jax
import jax.numpy as jnp
from jax import lax
from jax.experimental import pallas as pl
from jax.experimental.pallas import tpu as pltpu


def _mask_head_kernel(x_ref, w_ref, b_ref, o_ref):
    # x_ref: (bn, C_in, HW)     block of images, channels-major (native NCHW)
    # w_ref: (n_classes, C_in)  1x1-conv weight as a matrix
    # b_ref: (n_classes, 1)     bias (f32)
    # o_ref: (bn, n_classes, HW)
    bn = x_ref.shape[0]
    n_classes = w_ref.shape[0]
    hw = x_ref.shape[-1]

    w = w_ref[...]
    # Hoist the bias broadcast out of the per-image loop: JAX does not CSE
    # broadcast_in_dim, so leaving `+ b` inside an unrolled body would emit
    # one broadcast per unrolled iteration.
    b_bcast = jnp.broadcast_to(b_ref[...], (n_classes, hw))

    def body(n, carry):
        # One MXU matmul per image with f32 accumulation; bias add + sigmoid
        # happen on the f32 accumulator (exp/recip go to the EUP slot and
        # stay hidden under the DMA on all generations).
        logits = jnp.dot(w, x_ref[n], preferred_element_type=jnp.float32) + b_bcast
        o_ref[n] = jax.nn.sigmoid(logits).astype(o_ref.dtype)
        return carry

    # fori_loop with a modest unroll: keeps LLO scheduling visibility without
    # the vreg blow-up of a fully unrolled Python loop at large bn.
    lax.fori_loop(0, bn, body, 0, unroll=min(4, bn))


def _round_up(x, m):
    return -(-x // m) * m


def _vmem_limit_bytes():
    """Generation-aware VMEM limit (<= ~56 MiB on v7x, ~100 MiB on v5e/v6e)."""
    try:
        cap = int(pltpu.get_tpu_info().vmem_capacity_bytes)
    except Exception:  # conservative fallback (v7x-sized)
        cap = 64 * 1024 * 1024
    limit = min(cap - (8 << 20), 100 << 20)   # leave headroom for scratch
    return max(limit, 32 << 20)


def mask_rcnn_outputs_forward(x_nchw, weight, bias, *, images_per_step=None,
                              out_dtype=None):
    """Forward pass of mask_rcnn_outputs (inference mode: 1x1 conv + sigmoid).

    Args:
      x_nchw: (N, C_in, H, W) input, PyTorch NCHW convention.  May be f32 or
        bf16; pass bf16 from the producer on bandwidth-limited chips (v5e in
        particular) -- the matmul always accumulates in f32, and the weight is
        cast to x's dtype.
      weight: (n_classes, C_in, 1, 1) conv weight (PyTorch Conv2d layout).
      bias:   (n_classes,) conv bias.
      images_per_step: images per grid step.  Default: 32 for f32 I/O, 64 for
        bf16 I/O, clamped against the per-generation VMEM budget and so that
        the grid keeps >= 2 steps.
      out_dtype: output dtype (defaults to x's dtype).
    Returns:
      (N, n_classes, H, W) sigmoid mask probabilities.
    """
    N, C_in, H, W = x_nchw.shape
    n_classes = weight.shape[0]
    HW = H * W
    out_dtype = x_nchw.dtype if out_dtype is None else jnp.dtype(out_dtype)
    in_dtype = x_nchw.dtype

    # Free reshape: NCHW is already contiguous as (N, C_in, H*W). No transposes.
    x = x_nchw.reshape(N, C_in, HW)
    w = weight.reshape(n_classes, C_in).astype(in_dtype)   # match MXU input dtype
    b = bias.reshape(n_classes, 1).astype(jnp.float32)     # f32 epilogue

    vmem_limit = _vmem_limit_bytes()

    # --- choose the per-step image-block size bn -----------------------------
    if images_per_step is None:
        images_per_step = 64 if jnp.dtype(in_dtype).itemsize <= 2 else 32

    # VMEM-feasibility: double-buffered input + output blocks (with (8/16,128)
    # tile padding) must fit comfortably inside the limit.
    in_item = jnp.dtype(in_dtype).itemsize
    out_item = jnp.dtype(out_dtype).itemsize
    in_sub = 16 if in_item == 2 else 8
    out_sub = 16 if out_item == 2 else 8
    lane = _round_up(HW, 128)
    in_img_bytes = _round_up(C_in, in_sub) * lane * in_item
    out_img_bytes = _round_up(n_classes, out_sub) * lane * out_item
    budget = int(vmem_limit * 0.75)
    bn_cap = max(1, budget // (2 * (in_img_bytes + out_img_bytes)))

    bn = min(images_per_step, bn_cap, N)
    if N > 1:
        # Keep >= 2 grid steps so megacore sharding (v7x, 2 TCs/chip) always
        # has work for both cores.
        bn = min(bn, -(-N // 2))
    bn = max(1, bn)

    grid = (pl.cdiv(N, bn),)   # partial last block handled by pipeline masking

    out = pl.pallas_call(
        _mask_head_kernel,
        out_shape=jax.ShapeDtypeStruct((N, n_classes, HW), out_dtype),
        grid_spec=pltpu.PrefetchScalarGridSpec(
            num_scalar_prefetch=0,
            grid=grid,
            in_specs=[
                # Block of images; last two dims are the full (C_in, HW) extents.
                pl.BlockSpec((bn, C_in, HW), lambda i: (i, 0, 0)),
                # Weight / bias: constant block index -> fetched once, reused.
                pl.BlockSpec((n_classes, C_in), lambda i: (0, 0)),
                pl.BlockSpec((n_classes, 1), lambda i: (0, 0)),
            ],
            # Output minor dim is HW (lane-dense), not n_classes.
            out_specs=pl.BlockSpec((bn, n_classes, HW), lambda i: (i, 0, 0)),
        ),
        compiler_params=pltpu.CompilerParams(
            dimension_semantics=("parallel",),   # megacore-shard on v7x
            vmem_limit_bytes=int(vmem_limit),
        ),
    )(x, w, b)

    # Free reshape back to NCHW.
    return out.reshape(N, n_classes, H, W)


def reference_forward(x_nchw, weight, bias):
    """Pure-JAX reference mirroring the PyTorch module (1x1 conv + sigmoid)."""
    w_mat = weight.reshape(weight.shape[0], weight.shape[1])  # (n_classes, C_in)
    y = jnp.einsum("nchw,kc->nkhw", x_nchw.astype(jnp.float32), w_mat) \
        + bias[None, :, None, None]
    return jax.nn.sigmoid(y)


if __name__ == "__main__":
    key = jax.random.PRNGKey(0)
    k_x, k_w, k_x2 = jax.random.split(key, 3)

    # Small shapes consistent with the module: dim_in channels, square mask ROI.
    N, C_in, H, W = 2, 32, 16, 16
    n_classes = 8

    x = jax.random.normal(k_x, (N, C_in, H, W), dtype=jnp.float32)
    # _init_weights: normal(std=0.001) for weight, zeros for bias (MSRAFill
    # branch only changes the init distribution; normal init is used here).
    weight = 0.001 * jax.random.normal(k_w, (n_classes, C_in, 1, 1), dtype=jnp.float32)
    bias = jnp.zeros((n_classes,), dtype=jnp.float32)

    # TODO(synk): cfg.MRCNN.UPSAMPLE_RATIO > 1 (BilinearInterpolation2d) and the
    # cfg.MRCNN.USE_FC_OUTPUT Linear branch are not exercised here.

    ref = reference_forward(x, weight, bias)

    # 1) f32 path, tight tolerance.
    out = mask_rcnn_outputs_forward(x, weight, bias)
    jax.block_until_ready(out)
    assert out.shape == (N, n_classes, H, W)
    assert jnp.allclose(out, ref, atol=1e-5, rtol=1e-5)

    # 2) bf16 end-to-end I/O path (halves HBM read+write bytes; f32
    #    accumulation inside the kernel; bf16 weight cast is part of the
    #    contract -> loose tolerance).
    out_bf16 = mask_rcnn_outputs_forward(x.astype(jnp.bfloat16), weight, bias)
    jax.block_until_ready(out_bf16)
    assert out_bf16.dtype == jnp.bfloat16
    assert jnp.allclose(out_bf16.astype(jnp.float32), ref, atol=2e-2, rtol=2e-2)

    # 3) Ragged image count (N not a multiple of the image block): the pipeline
    #    masks the partial last block's writeback -- no host-side padding,
    #    including with the dynamic fori_loop index inside the kernel.
    N2 = 5
    x2 = jax.random.normal(k_x2, (N2, C_in, H, W), dtype=jnp.float32)
    out2 = mask_rcnn_outputs_forward(x2, weight, bias, images_per_step=4)
    jax.block_until_ready(out2)
    ref2 = reference_forward(x2, weight, bias)
    assert out2.shape == (N2, n_classes, H, W)
    assert jnp.allclose(out2, ref2, atol=1e-5, rtol=1e-5)

    print("KERNEL_OK")
</pallas_src>

<mosaic_0001>
module attributes {stable_mosaic.version = 11 : i64} {
  func.func @_mask_head_kernel(%arg0: i32, %arg1: memref<1x32x256xf32, #tpu.memory_space<vmem>>, %arg2: memref<8x32xf32, #tpu.memory_space<vmem>>, %arg3: memref<8x1xf32, #tpu.memory_space<vmem>>, %arg4: memref<1x8x256xf32, #tpu.memory_space<vmem>>) attributes {dimension_semantics = [#tpu.dimension_semantics<parallel>], iteration_bounds = array<i64: 2>, scalar_prefetch = 0 : i64, scratch_operands = 0 : i64, tpu.core_type = #tpu.core_type<tc>, window_params = [{transform_indices = @transform_0, window_bounds = array<i64: 1, 32, 256>}, {pipeline_mode = #tpu.pipeline_mode<synchronous>, transform_indices = @transform_1, window_bounds = array<i64: 8, 32>}, {pipeline_mode = #tpu.pipeline_mode<synchronous>, transform_indices = @transform_2, window_bounds = array<i64: 8, 1>}, {transform_indices = @transform_3, window_bounds = array<i64: 1, 8, 256>}]} {
    %c0 = arith.constant 0 : index
    %c0_0 = arith.constant 0 : index
    %0 = vector.load %arg2[%c0, %c0_0] : memref<8x32xf32, #tpu.memory_space<vmem>>, vector<8x32xf32>
    %c0_1 = arith.constant 0 : index
    %c0_2 = arith.constant 0 : index
    %1 = vector.load %arg3[%c0_1, %c0_2] : memref<8x1xf32, #tpu.memory_space<vmem>>, vector<8x1xf32>
    %2 = vector.shape_cast %1 : vector<8x1xf32> to vector<8x1xf32>
    %3 = vector.broadcast %2 : vector<8x1xf32> to vector<8x256xf32>
    %c0_i32 = arith.constant 0 : i32
    %4 = arith.index_cast %c0_i32 : i32 to index
    %c0_3 = arith.constant 0 : index
    %c0_4 = arith.constant 0 : index
    %5 = vector.load %arg1[%4, %c0_3, %c0_4] : memref<1x32x256xf32, #tpu.memory_space<vmem>>, vector<1x32x256xf32>
    %6 = vector.shape_cast %5 : vector<1x32x256xf32> to vector<32x256xf32>
    %cst = arith.constant dense<0.000000e+00> : vector<8x256xf32>
    %7 = tpu.matmul %0, %6, %cst {dimension_numbers = #tpu.dot_dimension_numbers<[1], [0], [0], [1], [0, 0, 1, 1], [], []>} : vector<8x32xf32>, vector<32x256xf32>, vector<8x256xf32> -> vector<8x256xf32>
    %8 = arith.addf %7, %3 : vector<8x256xf32>
    %9 = arith.negf %8 : vector<8x256xf32>
    %10 = math.exp %9 : vector<8x256xf32>
    %cst_5 = arith.constant 1.000000e+00 : f32
    %11 = vector.broadcast %cst_5 : f32 to vector<8x256xf32>
    %12 = arith.addf %11, %10 : vector<8x256xf32>
    %13 = arith.divf %11, %12 : vector<8x256xf32>
    %14 = arith.index_cast %c0_i32 : i32 to index
    %c0_6 = arith.constant 0 : index
    %c0_7 = arith.constant 0 : index
    %15 = vector.load %arg4[%14, %c0_6, %c0_7] : memref<1x8x256xf32, #tpu.memory_space<vmem>>, vector<1x8x256xf32>
    %16 = vector.shape_cast %15 : vector<1x8x256xf32> to vector<8x256xf32>
    %17 = vector.shape_cast %13 : vector<8x256xf32> to vector<1x8x256xf32>
    tpu.vector_store %arg4[%14, %c0_6, %c0_7], %17 {strides = array<i32>} : memref<1x8x256xf32, #tpu.memory_space<vmem>>, vector<1x8x256xf32>,
    %c1_i32 = arith.constant 1 : i32
    return
  }
  func.func @transform_0(%arg0: i32) -> (i32, i32, i32) {
    %c0_i32 = arith.constant 0 : i32
    %c0_i32_0 = arith.constant 0 : i32
    %c0_i32_1 = arith.constant 0 : i32
    return %arg0, %c0_i32, %c0_i32_0 : i32, i32, i32
  }
  func.func @transform_1(%arg0: i32) -> (i32, i32) {
    %c0_i32 = arith.constant 0 : i32
    %c0_i32_0 = arith.constant 0 : i32
    %c0_i32_1 = arith.constant 0 : i32
    return %c0_i32, %c0_i32_0 : i32, i32
  }
  func.func @transform_2(%arg0: i32) -> (i32, i32) {
    %c0_i32 = arith.constant 0 : i32
    %c0_i32_0 = arith.constant 0 : i32
    %c0_i32_1 = arith.constant 0 : i32
    return %c0_i32, %c0_i32_0 : i32, i32
  }
  func.func @transform_3(%arg0: i32) -> (i32, i32, i32) {
    %c0_i32 = arith.constant 0 : i32
    %c0_i32_0 = arith.constant 0 : i32
    %c0_i32_1 = arith.constant 0 : i32
    return %arg0, %c0_i32, %c0_i32_0 : i32, i32, i32
  }
}

</mosaic_0001>

<bundles_post_ra>
// kernel: tpu_custom_call.1
= control target key start
LH: loop header
LB: loop body
LE: loop exit
PB: predicated region body
PF: predicated region fallthrough
CT: control target
= control target key end

     0   :  { %8 = vsyncpa [#allocation3], 0  ;;  %s755_s0 = inlined_call_operand.hbm [shape: f32[2,32,256], index: 0, kind: input, shape index: {}]   ;;  %s756_s1 = inlined_call_operand.vmem [shape: f32[8,32], index: 1, kind: input, shape index: {}]   ;;  %s757_s2 = inlined_call_operand.vmem [shape: f32[8,1], index: 2, kind: input, shape index: {}]   ;;  %s758_s3 = inlined_call_operand.hbm [shape: f32[2,8,256], index: 3, kind: output, shape index: {}]  }
   0x1   :  { %10 = vsyncpa [#allocation3 + $0x1], 0 }
   0x2   :  { %11 = vsyncpa [#allocation4], 0 }
   0x3   :  { %13 = vsyncpa [#allocation4 + $0x1], 0  ;;  %s588_s12 = smov 0   ;;  %s590_s13 = smov 0  }
   0x4   :  { %s592_s14 = smov 0   ;;  %s594_s15 = smov 0  }
   0x5 LB: > { %s609_s16 = sadd.s32 4294967295, %s560_s15   ;;  %s378_s17 = sadd.s32 4294967294, %s560_s15   ;;  %s560_s15 = sphi %s594_s15, %s771_s15   ;;  %s556_s14 = sphi %s592_s14, %s770_s14   ;;  %s552_s13 = sphi %s590_s13, %s769_s13   ;;  %s548_s12 = sphi %s588_s12, %s768_s12  }
   0x6   : > { %s613_s18 = sadd.s32 1, %s560_s15   ;;  %s26_s19 = sadd.s32 1, %s556_s14 }
   0x7   : > { %s23_s20 = ssub.s32 %s560_s15, %s613_s18  ;;  %p33_p0 = scmp.ne.s32.totalorder %s556_s14, %s552_s13 }
   0x8   : > { %p24_p1 = scmp.eq.s32.totalorder %s23_s20, 0  ;;  %p34_p2 = scmp.eq.s32.totalorder %s560_s15, 0 }
   0x9   : > { %p39_p3 = scmp.ne.s32.totalorder %s552_s13, %s548_s12  ;;  %p40_p4 = scmp.eq.s32.totalorder %s609_s16, 0 }
   0xa   : > { %s625_s21 = scalar_select %p24_p1, %s556_s14, %s26_s19  }
   0xb   : > { %p627_p5 = por %p34_p2, %p33_p0  ;;  %p631_p6 = por %p40_p4, %p39_p3 }
   0xc   : > { %p105_p7 = scmp.eq.s32.totalorder %s609_s16, 1  ;;  %p111_p8 = scmp.eq.s32.totalorder %s378_s17, 1 }
   0xd   : > { %p417_p10 = scmp.lt.s32.totalorder %s560_s15, 2  ;;  %s137_s26 = sand.u32 1, %s556_s14  }
   0xe   : > { %p638_p11 = por %p105_p7, %p33_p0  ;;  %p642_p12 = por %p111_p8, %p39_p3 }
   0xf   : > { %s395_s27 = sshll.u32 %s560_s15, 10  ;;  %s381_s28 = sshll.u32 %s137_s26, 6 }
  0x10   : > { %s762_s24 = scalar_select %p638_p11, 1, 0 }
  0x11   : > { %s763_s25 = scalar_select %p642_p12, 1, 0 }
  0x12   : > { %s651_s4 = scalar_lea.hbm %s755_s0, %s395_s27  ;;  %s141_s5 = scalar_lea.vmem [#allocation2], %s381_s28 }
  0x13   : > { %s148_s6 = sshll.u32 %s141_s5, 4  ;;  %p655_p13 = pnand %p417_p10, %p627_p5  ;;  %s659_s6 = int_to_ptr.vmem [resolvable:$true] %s148_s6 }
  0x14   : > { %s661_s8 = scalar_lea.sflag [#allocation3], %s137_s26  ;;  %s464_s9 = scalar_lea.hbm %s651_s4, 1024 }
  0x15   : > { %p465_p0 = scmp.ne.s32.totalorder %s651_s4, %s464_s9  ;;  %p466_p1 = pneg %p655_p13 }
  0x16   : > { %s469_s17 = scalar_lea.hbm %s755_s0, 2048  ;;  %p470_p4 = scmp.lt.u32.totalorder %s651_s4, %s755_s0 }
  0x17   : > { %p467_p2 = pnand %p466_p1, %p465_p0  ;;  %p471_p5 = scmp.lt.u32.totalorder %s469_s17, %s464_s9 }
  0x18   : > { %p473_p8 = scmp.lt.u32.totalorder %s464_s9, %s651_s4 }
  0x19   : > { %p468_p3 = pneg %p467_p2  ;;  %p472_p7 = por %p471_p5, %p470_p4 }
  0x1b   : > { %p474_p10 = por %p473_p8, %p472_p7 }
  0x1d   : > { %p475_p9 = pnand %p474_p10, %p468_p3 }
  0x1f   : > { %478 = shalt.err (!%p475_p9)
}
  0x20   : > { %s479_s22 = scalar_lea.vmem %s659_s6, 1024  ;;  %s562_s26 = smov [#allocation2]  }
  0x21   : > { %p480_p0 = scmp.ne.s32.totalorder %s659_s6, %s479_s22  ;;  %s484_s27 = sshll.u32 %s562_s26, 4  ;;  %s485_s27 = int_to_ptr.vmem [resolvable:$false] %s484_s27 }
  0x22   : > { %s486_s28 = scalar_lea.vmem %s485_s27, 2048  ;;  %p487_p11 = scmp.lt.s32.totalorder %s659_s6, %s485_s27 }
  0x23   : > { %p482_p2 = pnand %p480_p0, %p466_p1  ;;  %p488_p4 = scmp.lt.s32.totalorder %s486_s28, %s479_s22 }
  0x25   : > { %p483_p12 = pneg %p482_p2  ;;  %p489_p5 = por %p488_p4, %p487_p11 }
  0x27   : > { %p490_p7 = pnand %p489_p5, %p483_p12 }
  0x29   : > { %493 = shalt.err (!%p490_p7)
}
  0x2a   : > { %s563_s29 = smov 256   ;;  %s564_s30 = smov 16  }
  0x2b   : > { %412 = dma.hbm_to_vmem [thread:$0]  (!%p655_p13), %s651_s4, 1024, %s659_s6, %s661_s8, %s563_s29, %s563_s29, %s564_s30  }
  0x2c   : > { %p384_p9 = scmp.ge.s32.totalorder %s560_s15, 1  ;;  %p156_p1 = scmp.lt.s32.totalorder %s560_s15, 3 }
  0x2e   : > { %p157_p3 = pnand %p384_p9, %p156_p1 }
  0x2f   : > { %s692_s5 = sand.u32 (!%p157_p3), 1, %s552_s13  }
  0x30   : > { %160 = sbr.rel (%p157_p3) target bundleno = 322 (0x142), region = 32  ;;  %s385_s9 = sshll.u32 (!%p157_p3), %s692_s5, 6 }
  0x31   : > { %s163_s10 = scalar_lea.sflag (!%p157_p3), [#allocation3], %s692_s5  ;;  %s166_s11 = scalar_lea.vmem (!%p157_p3), [#allocation2], %s385_s9 }
  0x37   : > { %539 = dma.done.wait (%p631_p6), %s163_s10, 1024  }
  0x38   : > { %541 = vsyncadd (%p631_p6), %s163_s10, 4294966272  ;;  %v565_v0 = vmov 0.0   ;;  %v566_v1 = vmov 0   ;;  %v197_v2 = vld [vmem:[%s166_s11 + $0x8] sm:$0xff]  ;;  %v199_v3 = vld [vmem:[%s166_s11 + $0x18] sm:$0xff]  ;;  %vm204_vm0 = vcmask 261120  }
  0x39   : > { %272 = vmatprep.mubr.f32.mxu0 %v565_v0  ;;  %455 = vset.pattern.permute.xlu0 %v566_v1  ;;  %v196_v4 = vld [vmem:[%s166_s11] sm:$0xff]  ;;  %v397_v5 = vpack.c.bf16 %v199_v3, %v197_v2  ;;  %v198_v6 = vld [vmem:[%s166_s11 + $0x10] sm:$0xff]  ;;  %v201_v7 = vld [vmem:[%s166_s11 + $0x28] sm:$0xff]  ;;  %s386_s8 = sshll.u32 %s692_s5, 4  ;;  %s396_s17 = sshll.u32 %s609_s16, 8 }
  0x3a   : > { %v203_v8 = vld [vmem:[%s166_s11 + $0x38] sm:$0xff]  ;;  %v399_v9 = vpack.c.bf16 %v198_v6, %v196_v4  ;;  %v200_v11 = vld [vmem:[%s166_s11 + $0x20] sm:$0xff]  ;;  %v202_v12 = vld [vmem:[%s166_s11 + $0x30] sm:$0xff]  ;;  %s188_s19 = scalar_lea.vmem [#allocation5], %s386_s8  ;;  %s711_s27 = scalar_lea.hbm %s758_s3, %s396_s17 }
  0x3b   : > { %v401_v10 = vpack.c.bf16 %v203_v8, %v201_v7  ;;  %398 = vmatprep.subr.bf16.mxu0 %v397_v5  ;;  %v190_v13 = vld [vmem:[%s757_s2] sm:$0xff]  ;;  %v403_v14 = vpack.c.bf16 %v202_v12, %v200_v11  ;;  %s308_s20 = sshll.u32 %s188_s19, 4  ;;  %s294_s28 = scalar_lea.sflag [#allocation4], %s692_s5  ;;  %s713_s20 = int_to_ptr.vmem [resolvable:$true] %s308_s20 }
  0x3c   : > { %400 = vmatpush1.bf16.msra.mxu0 %v399_v9  ;;  %193 = vperm.xlu0 %455, %v190_v13   ;;  %v189_v15 = vld [vmem:[%s756_s1] sm:$0xff]  ;;  %s494_s29 = scalar_lea.vmem %s713_s20, 256  ;;  %p765_p11 = scmp.ne.s32.totalorder %s762_s24, 0 }
  0x3d   : > { %402 = vmatprep.subr.bf16.mxu0 %v401_v10  ;;  %p495_p6 = scmp.ne.s32.totalorder %s713_s20, %s494_s29  ;;  %s567_s16 = smov [#allocation5]  }
  0x3e   : > { %s498_s30 = sshll.u32 %s567_s16, 4  ;;  %s499_s30 = int_to_ptr.vmem [resolvable:$false] %s498_s30 }
  0x3f   : > { %p496_p12 = pnand %p495_p6, %p765_p11  ;;  %s500_s9 = scalar_lea.vmem %s499_s30, 512 }
  0x40   : > { %404 = vmatpush1.bf16.msra.mxu0 %v403_v14  ;;  %p501_p8 = scmp.lt.s32.totalorder %s713_s20, %s499_s30  ;;  %p502_p10 = scmp.lt.s32.totalorder %s500_s9, %s494_s29 }
  0x41   : > { %p497_p13 = pneg %p496_p12 }
  0x42   : > { %p503_p0 = por %p502_p10, %p501_p8 }
  0x43   : > { %387 = vmatmul.mubr.msk.f32.vlgmr.msra.gmra.mrb[0].mxu0 %vm204_vm0, %v189_v15 }
  0x44   : > { %p504_p2 = pnand %p503_p0, %p497_p13 }
  0xbb   : > { %v194_v16 = vpop.permute.xlu0 %193 }
 0x116   : > { %v274_v17 = vpop.f32.mrb[0].mxu0 }
 0x117   : > { %v275_v18 = vadd.f32 %v274_v17, %v194_v16  ;;  %v276_v19 = vpop.f32.mrb[1].mxu0 }
 0x118   : > { %v277_v20 = vadd.f32 %v276_v19, %v194_v16 }
 0x119   : > { %v388_v21 = vmul.f32 -1.442695, %v275_v18 }
 0x11a   : > { %v389_v22 = vmul.f32 -1.442695, %v277_v20 }
 0x11b   : > { %456 = vpow2.f32 %v388_v21 }
 0x11c   : > { %458 = vpow2.f32 %v389_v22 }
 0x125   : > { %v457_v23 = vpop.eup %456 }
 0x126   : > { %v459_v24 = vpop.eup %458  ;;  %v285_v25 = vadd.f32 1.0, %v457_v23 }
 0x127   : > { %v286_v26 = vadd.f32 1.0, %v459_v24 }
 0x128   : > { %460 = vrcp.f32 %v285_v25 }
 0x129   : > { %462 = vrcp.f32 %v286_v26 }
 0x132   : > { %v461_v27 = vpop.eup %460 }
 0x133   : > { %v463_v28 = vpop.eup %462  ;;  %291 = vst [vmem:[%s188_s19] sm:$0xff] %v461_v27 }
 0x134   : > { %292 = vst [vmem:[%s188_s19 + $0x8] sm:$0xff] %v463_v28 }
 0x135   : > { %507 = shalt.err (!%p504_p2)
}
 0x136   : > { %s508_s5 = scalar_lea.hbm %s711_s27, 256  ;;  %s512_s4 = scalar_lea.hbm %s758_s3, 512 }
 0x137   : > { %p509_p4 = scmp.ne.s32.totalorder %s711_s27, %s508_s5  ;;  %p513_p9 = scmp.lt.u32.totalorder %s711_s27, %s758_s3 }
 0x138   : > { %p514_p1 = scmp.lt.u32.totalorder %s512_s4, %s508_s5  ;;  %p516_p6 = scmp.lt.u32.totalorder %s508_s5, %s711_s27 }
 0x139   : > { %p510_p5 = pnand %p509_p4, %p765_p11 }
 0x13a   : > { %p515_p3 = por %p514_p1, %p513_p9 }
 0x13b   : > { %p511_p7 = pneg %p510_p5 }
 0x13c   : > { %p517_p12 = por %p516_p6, %p515_p3 }
 0x13e   : > { %p518_p13 = pnand %p517_p12, %p511_p7 }
 0x140   : > { %521 = shalt.err (!%p518_p13)
}
 0x141   : > { %407 = dma.vmem_to_hbm [thread:$0]  (%p765_p11), %s713_s20, 256, %s711_s27, %s294_s28  }
 0x142 PF: > { %s320_s7 = sand.u32 1, %s548_s12   ;;  %p766_p8 = scmp.ne.s32.totalorder %s763_s25, 0 }
 0x143   : > { %p767_p10 = scmp.ge.s32.totalorder %s560_s15, 2  ;;  %s321_s8 = scalar_lea.sflag [#allocation4], %s320_s7 }
 0x145   : > { %p414_p0 = pnand %p767_p10, %p766_p8 }
 0x147   : > { %543 = dma.done.wait (!%p414_p0), %s321_s8, 256  }
 0x148   : > { %545 = vsyncadd (!%p414_p0), %s321_s8, 4294967040  ;;  %p16_p2 = scmp.ge.s32.totalorder %s613_s18, 4   ;;  %s768_s12 = smov %s552_s13 }
 0x149   : > { %s769_s13 = smov %s556_s14  ;;  %s770_s14 = smov %s625_s21 }
 0x14a   : > { %s771_s15 = smov %s613_s18  ;;  %18 = sbr.rel (!%p16_p2) target bundleno = 5 (0x5), region = 77 }
 0x151   :  { %326 = vsyncpa [#allocation3], 1 }
 0x152   :  { %328 = vsyncpa [#allocation3 + $0x1], 1 }
 0x153   :  { %329 = vsyncpa [#allocation4], 1 }
 0x154   :  { %331 = vsyncpa [#allocation4 + $0x1], 1 }

</bundles_post_ra>
